<compile_context>
chip_gen: v5e
topology: v5e:2x2
jax: 0.10.0
libtpu: 0.0.40
codegen_flags: <defaults>
</compile_context>

<pallas_src>
import jax
import jax.numpy as jnp
import numpy as np
from jax.experimental import pallas as pl
from jax.experimental.pallas import tpu as pltpu

# Full-f32 matmuls everywhere (wrapper projection, reference) so 1e-5 holds on the MXU.
jax.config.update("jax_default_matmul_precision", "highest")


def _rnn_kernel(x_proj_ref, h0_ref, whh_t_ref, fc_slab_ref, out_ref, hn_ref):
    S = x_proj_ref.shape[0]
    H = whh_t_ref.shape[0]

    # Hoist the recurrent weight into a local once (tiny; resident in vregs).
    whh_t = whh_t_ref[...]          # (H, H)
    h = h0_ref[0]                   # (B, H)

    # Serial recurrence, fully unrolled (S is small & static).  Per-step critical path
    # is a single (B,H)@(H,H) MXU push + add + tanh; the x-projection is precomputed.
    for t in range(S):
        h = jnp.tanh(
            x_proj_ref[t]           # (B, H), leading-axis load
            + jnp.dot(h, whh_t, preferred_element_type=jnp.float32,
                      precision=jax.lax.Precision.HIGHEST))

    # fc(out[-1]) + log-softmax on the last hidden state; W_fc^T and b_fc are packed
    # in one slab -> static zero-cost ref slices.
    wfc_t = fc_slab_ref[:H, :]      # (H, O)
    b_fc = fc_slab_ref[H:H + 1, :]  # (1, O)
    logits = jnp.dot(h, wfc_t, preferred_element_type=jnp.float32,
                     precision=jax.lax.Precision.HIGHEST) + b_fc
    m = jnp.max(logits, axis=-1, keepdims=True)
    lse = jnp.log(jnp.sum(jnp.exp(logits - m), axis=-1, keepdims=True)) + m
    out_ref[...] = logits - lse
    hn_ref[0] = h


@jax.jit
def rnn_forward(x, h0, w_ih, w_hh, b_ih, b_hh, w_fc, b_fc):
    """x: (batch, seq, input_size); h0: (1, batch, hidden)."""
    B, S, I = x.shape
    H = w_ih.shape[0]
    O = w_fc.shape[0]

    x_f = x.astype(jnp.float32)
    h0_f = h0.astype(jnp.float32)                         # (1, B, H)
    whh_t = w_hh.T.astype(jnp.float32)                    # (H, H)

    # Hoisted input projection (off the serial chain): (S, B, H) = x @ W_ih^T + b_ih + b_hh.
    x_proj = (jnp.einsum('bsi,hi->sbh', x_f, w_ih.astype(jnp.float32),
                         precision=jax.lax.Precision.HIGHEST)
              + (b_ih + b_hh).astype(jnp.float32))

    # [W_fc^T ; b_fc] packed into a single (H+1, O) slab -> one DMA instead of two.
    fc_slab = jnp.concatenate(
        [w_fc.T.astype(jnp.float32), b_fc.reshape(1, O).astype(jnp.float32)], axis=0)

    vmem = lambda: pl.BlockSpec(memory_space=pltpu.MemorySpace.VMEM)

    out, hn = pl.pallas_call(
        _rnn_kernel,
        out_shape=(
            jax.ShapeDtypeStruct((B, O), jnp.float32),
            jax.ShapeDtypeStruct((1, B, H), jnp.float32),
        ),
        # Single invocation (no grid): every operand is one whole-array VMEM block.
        in_specs=[vmem() for _ in range(4)],
        out_specs=(vmem(), vmem()),
        input_output_aliases={1: 1},   # h0 HBM buffer reused for hn
    )(x_proj, h0_f, whh_t, fc_slab)
    return out, hn


def rnn_forward_ref(x, h0, w_ih, w_hh, b_ih, b_hh, w_fc, b_fc):
    """Pure-JAX reference mirroring the PyTorch module."""
    x_tm = jnp.transpose(x, (1, 0, 2))  # (S, B, I)
    h = h0[0]

    def step(h, x_t):
        h_new = jnp.tanh(x_t @ w_ih.T + b_ih + h @ w_hh.T + b_hh)
        return h_new, h_new

    h_last, _ = jax.lax.scan(step, h, x_tm)
    logits = h_last @ w_fc.T + b_fc
    logp = jax.nn.log_softmax(logits, axis=-1)
    return logp, h_last[None]


if __name__ == "__main__":
    # Module hyperparameters (small, deterministic).
    batch = 2
    seq = 8
    input_size = 8
    hidden_size = 32
    output_size = 16
    num_layers = 1

    key = jax.random.PRNGKey(0)
    keys = jax.random.split(key, 8)
    bound_rnn = 1.0 / np.sqrt(hidden_size)
    bound_fc = 1.0 / np.sqrt(hidden_size)

    # Deterministic parameter init (uniform, like PyTorch's default ranges).
    w_ih = jax.random.uniform(keys[0], (hidden_size, input_size), jnp.float32,
                              -bound_rnn, bound_rnn)
    w_hh = jax.random.uniform(keys[1], (hidden_size, hidden_size), jnp.float32,
                              -bound_rnn, bound_rnn)
    b_ih = jax.random.uniform(keys[2], (hidden_size,), jnp.float32,
                              -bound_rnn, bound_rnn)
    b_hh = jax.random.uniform(keys[3], (hidden_size,), jnp.float32,
                              -bound_rnn, bound_rnn)
    w_fc = jax.random.uniform(keys[4], (output_size, hidden_size), jnp.float32,
                              -bound_fc, bound_fc)
    b_fc = jax.random.uniform(keys[5], (output_size,), jnp.float32,
                              -bound_fc, bound_fc)

    # Inputs: x is (batch, seq, input_size); h0 = initHidden() = zeros.
    x = jax.random.normal(keys[6], (batch, seq, input_size), jnp.float32)
    h0 = jnp.zeros((num_layers, batch, hidden_size), jnp.float32)

    out, hn = rnn_forward(x, h0, w_ih, w_hh, b_ih, b_hh, w_fc, b_fc)
    out, hn = jax.block_until_ready(out), jax.block_until_ready(hn)

    # Sanity check against pure-JAX reference (all math kept in f32 / HIGHEST precision).
    out_ref, hn_ref = rnn_forward_ref(x, h0, w_ih, w_hh, b_ih, b_hh, w_fc, b_fc)
    np.testing.assert_allclose(np.asarray(out), np.asarray(out_ref), rtol=1e-5, atol=1e-5)
    np.testing.assert_allclose(np.asarray(hn), np.asarray(hn_ref), rtol=1e-5, atol=1e-5)

    print("KERNEL_OK")
</pallas_src>

<mosaic_0001>
module attributes {stable_mosaic.version = 11 : i64} {
  func.func @_rnn_kernel(%arg0: memref<8x2x32xf32, #tpu.memory_space<vmem>>, %arg1: memref<1x2x32xf32, #tpu.memory_space<vmem>>, %arg2: memref<32x32xf32, #tpu.memory_space<vmem>>, %arg3: memref<33x16xf32, #tpu.memory_space<vmem>>, %arg4: memref<2x16xf32, #tpu.memory_space<vmem>>, %arg5: memref<1x2x32xf32, #tpu.memory_space<vmem>>) attributes {dimension_semantics = [], scalar_prefetch = 0 : i64, scratch_operands = 0 : i64, tpu.core_type = #tpu.core_type<tc>} {
    %c0 = arith.constant 0 : index
    %c0_0 = arith.constant 0 : index
    %0 = vector.load %arg2[%c0, %c0_0] : memref<32x32xf32, #tpu.memory_space<vmem>>, vector<32x32xf32>
    %c0_1 = arith.constant 0 : index
    %c0_2 = arith.constant 0 : index
    %c0_3 = arith.constant 0 : index
    %1 = vector.load %arg1[%c0_1, %c0_2, %c0_3] : memref<1x2x32xf32, #tpu.memory_space<vmem>>, vector<1x2x32xf32>
    %2 = vector.shape_cast %1 : vector<1x2x32xf32> to vector<2x32xf32>
    %c0_4 = arith.constant 0 : index
    %c0_5 = arith.constant 0 : index
    %c0_6 = arith.constant 0 : index
    %3 = vector.load %arg0[%c0_4, %c0_5, %c0_6] : memref<8x2x32xf32, #tpu.memory_space<vmem>>, vector<1x2x32xf32>
    %4 = vector.shape_cast %3 : vector<1x2x32xf32> to vector<2x32xf32>
    %cst = arith.constant dense<0.000000e+00> : vector<2x32xf32>
    %5 = tpu.matmul %2, %0, %cst {dimension_numbers = #tpu.dot_dimension_numbers<[1], [0], [0], [1], [0, 0, 1, 1], [], []>, precision = #tpu.contract_precision<fp32>} : vector<2x32xf32>, vector<32x32xf32>, vector<2x32xf32> -> vector<2x32xf32>
    %6 = arith.addf %4, %5 : vector<2x32xf32>
    %7 = math.tanh %6 : vector<2x32xf32>
    %c1 = arith.constant 1 : index
    %c0_7 = arith.constant 0 : index
    %c0_8 = arith.constant 0 : index
    %8 = vector.load %arg0[%c1, %c0_7, %c0_8] : memref<8x2x32xf32, #tpu.memory_space<vmem>>, vector<1x2x32xf32>
    %9 = vector.shape_cast %8 : vector<1x2x32xf32> to vector<2x32xf32>
    %cst_9 = arith.constant dense<0.000000e+00> : vector<2x32xf32>
    %10 = tpu.matmul %7, %0, %cst_9 {dimension_numbers = #tpu.dot_dimension_numbers<[1], [0], [0], [1], [0, 0, 1, 1], [], []>, precision = #tpu.contract_precision<fp32>} : vector<2x32xf32>, vector<32x32xf32>, vector<2x32xf32> -> vector<2x32xf32>
    %11 = arith.addf %9, %10 : vector<2x32xf32>
    %12 = math.tanh %11 : vector<2x32xf32>
    %c2 = arith.constant 2 : index
    %c0_10 = arith.constant 0 : index
    %c0_11 = arith.constant 0 : index
    %13 = vector.load %arg0[%c2, %c0_10, %c0_11] : memref<8x2x32xf32, #tpu.memory_space<vmem>>, vector<1x2x32xf32>
    %14 = vector.shape_cast %13 : vector<1x2x32xf32> to vector<2x32xf32>
    %cst_12 = arith.constant dense<0.000000e+00> : vector<2x32xf32>
    %15 = tpu.matmul %12, %0, %cst_12 {dimension_numbers = #tpu.dot_dimension_numbers<[1], [0], [0], [1], [0, 0, 1, 1], [], []>, precision = #tpu.contract_precision<fp32>} : vector<2x32xf32>, vector<32x32xf32>, vector<2x32xf32> -> vector<2x32xf32>
    %16 = arith.addf %14, %15 : vector<2x32xf32>
    %17 = math.tanh %16 : vector<2x32xf32>
    %c3 = arith.constant 3 : index
    %c0_13 = arith.constant 0 : index
    %c0_14 = arith.constant 0 : index
    %18 = vector.load %arg0[%c3, %c0_13, %c0_14] : memref<8x2x32xf32, #tpu.memory_space<vmem>>, vector<1x2x32xf32>
    %19 = vector.shape_cast %18 : vector<1x2x32xf32> to vector<2x32xf32>
    %cst_15 = arith.constant dense<0.000000e+00> : vector<2x32xf32>
    %20 = tpu.matmul %17, %0, %cst_15 {dimension_numbers = #tpu.dot_dimension_numbers<[1], [0], [0], [1], [0, 0, 1, 1], [], []>, precision = #tpu.contract_precision<fp32>} : vector<2x32xf32>, vector<32x32xf32>, vector<2x32xf32> -> vector<2x32xf32>
    %21 = arith.addf %19, %20 : vector<2x32xf32>
    %22 = math.tanh %21 : vector<2x32xf32>
    %c4 = arith.constant 4 : index
    %c0_16 = arith.constant 0 : index
    %c0_17 = arith.constant 0 : index
    %23 = vector.load %arg0[%c4, %c0_16, %c0_17] : memref<8x2x32xf32, #tpu.memory_space<vmem>>, vector<1x2x32xf32>
    %24 = vector.shape_cast %23 : vector<1x2x32xf32> to vector<2x32xf32>
    %cst_18 = arith.constant dense<0.000000e+00> : vector<2x32xf32>
    %25 = tpu.matmul %22, %0, %cst_18 {dimension_numbers = #tpu.dot_dimension_numbers<[1], [0], [0], [1], [0, 0, 1, 1], [], []>, precision = #tpu.contract_precision<fp32>} : vector<2x32xf32>, vector<32x32xf32>, vector<2x32xf32> -> vector<2x32xf32>
    %26 = arith.addf %24, %25 : vector<2x32xf32>
    %27 = math.tanh %26 : vector<2x32xf32>
    %c5 = arith.constant 5 : index
    %c0_19 = arith.constant 0 : index
    %c0_20 = arith.constant 0 : index
    %28 = vector.load %arg0[%c5, %c0_19, %c0_20] : memref<8x2x32xf32, #tpu.memory_space<vmem>>, vector<1x2x32xf32>
    %29 = vector.shape_cast %28 : vector<1x2x32xf32> to vector<2x32xf32>
    %cst_21 = arith.constant dense<0.000000e+00> : vector<2x32xf32>
    %30 = tpu.matmul %27, %0, %cst_21 {dimension_numbers = #tpu.dot_dimension_numbers<[1], [0], [0], [1], [0, 0, 1, 1], [], []>, precision = #tpu.contract_precision<fp32>} : vector<2x32xf32>, vector<32x32xf32>, vector<2x32xf32> -> vector<2x32xf32>
    %31 = arith.addf %29, %30 : vector<2x32xf32>
    %32 = math.tanh %31 : vector<2x32xf32>
    %c6 = arith.constant 6 : index
    %c0_22 = arith.constant 0 : index
    %c0_23 = arith.constant 0 : index
    %33 = vector.load %arg0[%c6, %c0_22, %c0_23] : memref<8x2x32xf32, #tpu.memory_space<vmem>>, vector<1x2x32xf32>
    %34 = vector.shape_cast %33 : vector<1x2x32xf32> to vector<2x32xf32>
    %cst_24 = arith.constant dense<0.000000e+00> : vector<2x32xf32>
    %35 = tpu.matmul %32, %0, %cst_24 {dimension_numbers = #tpu.dot_dimension_numbers<[1], [0], [0], [1], [0, 0, 1, 1], [], []>, precision = #tpu.contract_precision<fp32>} : vector<2x32xf32>, vector<32x32xf32>, vector<2x32xf32> -> vector<2x32xf32>
    %36 = arith.addf %34, %35 : vector<2x32xf32>
    %37 = math.tanh %36 : vector<2x32xf32>
    %c7 = arith.constant 7 : index
    %c0_25 = arith.constant 0 : index
    %c0_26 = arith.constant 0 : index
    %38 = vector.load %arg0[%c7, %c0_25, %c0_26] : memref<8x2x32xf32, #tpu.memory_space<vmem>>, vector<1x2x32xf32>
    %39 = vector.shape_cast %38 : vector<1x2x32xf32> to vector<2x32xf32>
    %cst_27 = arith.constant dense<0.000000e+00> : vector<2x32xf32>
    %40 = tpu.matmul %37, %0, %cst_27 {dimension_numbers = #tpu.dot_dimension_numbers<[1], [0], [0], [1], [0, 0, 1, 1], [], []>, precision = #tpu.contract_precision<fp32>} : vector<2x32xf32>, vector<32x32xf32>, vector<2x32xf32> -> vector<2x32xf32>
    %41 = arith.addf %39, %40 : vector<2x32xf32>
    %42 = math.tanh %41 : vector<2x32xf32>
    %c0_28 = arith.constant 0 : index
    %c0_29 = arith.constant 0 : index
    %43 = vector.load %arg3[%c0_28, %c0_29] : memref<33x16xf32, #tpu.memory_space<vmem>>, vector<32x16xf32>
    %c32 = arith.constant 32 : index
    %c0_30 = arith.constant 0 : index
    %44 = vector.load %arg3[%c32, %c0_30] : memref<33x16xf32, #tpu.memory_space<vmem>>, vector<1x16xf32>
    %cst_31 = arith.constant dense<0.000000e+00> : vector<2x16xf32>
    %45 = tpu.matmul %42, %43, %cst_31 {dimension_numbers = #tpu.dot_dimension_numbers<[1], [0], [0], [1], [0, 0, 1, 1], [], []>, precision = #tpu.contract_precision<fp32>} : vector<2x32xf32>, vector<32x16xf32>, vector<2x16xf32> -> vector<2x16xf32>
    %46 = vector.broadcast %44 : vector<1x16xf32> to vector<2x16xf32>
    %47 = arith.addf %45, %46 : vector<2x16xf32>
    %cst_32 = arith.constant dense<0xFF800000> : vector<2xf32>
    %48 = vector.multi_reduction <maximumf>, %47, %cst_32 [1] : vector<2x16xf32> to vector<2xf32>
    %49 = vector.shape_cast %48 : vector<2xf32> to vector<2x1xf32>
    %50 = vector.broadcast %49 : vector<2x1xf32> to vector<2x16xf32>
    %51 = arith.subf %47, %50 : vector<2x16xf32>
    %52 = math.exp %51 : vector<2x16xf32>
    %cst_33 = arith.constant dense<0.000000e+00> : vector<2xf32>
    %53 = vector.multi_reduction <add>, %52, %cst_33 [1] : vector<2x16xf32> to vector<2xf32>
    %54 = vector.shape_cast %53 : vector<2xf32> to vector<2x1xf32>
    %55 = math.log %54 : vector<2x1xf32>
    %56 = arith.addf %55, %49 : vector<2x1xf32>
    %57 = vector.broadcast %56 : vector<2x1xf32> to vector<2x16xf32>
    %58 = arith.subf %47, %57 : vector<2x16xf32>
    %c0_34 = arith.constant 0 : index
    %c0_35 = arith.constant 0 : index
    %59 = vector.load %arg4[%c0_34, %c0_35] : memref<2x16xf32, #tpu.memory_space<vmem>>, vector<2x16xf32>
    tpu.vector_store %arg4[%c0_34, %c0_35], %58 {strides = array<i32>} : memref<2x16xf32, #tpu.memory_space<vmem>>, vector<2x16xf32>,
    %c0_36 = arith.constant 0 : index
    %c0_37 = arith.constant 0 : index
    %c0_38 = arith.constant 0 : index
    %60 = vector.load %arg5[%c0_36, %c0_37, %c0_38] : memref<1x2x32xf32, #tpu.memory_space<vmem>>, vector<1x2x32xf32>
    %61 = vector.shape_cast %60 : vector<1x2x32xf32> to vector<2x32xf32>
    %62 = vector.shape_cast %42 : vector<2x32xf32> to vector<1x2x32xf32>
    tpu.vector_store %arg5[%c0_36, %c0_37, %c0_38], %62 {strides = array<i32>} : memref<1x2x32xf32, #tpu.memory_space<vmem>>, vector<1x2x32xf32>,
    return
  }
}

</mosaic_0001>

<bundles_post_ra>
// kernel: rnn_forward.1
= control target key start
LH: loop header
LB: loop body
LE: loop exit
PB: predicated region body
PF: predicated region fallthrough
CT: control target
= control target key end

     0   :  { %11 = vsyncpa [#allocation3], 0  ;;  %s2274_s0 = inlined_call_operand.vmem [shape: f32[8,2,32], index: 0, kind: input, shape index: {}]   ;;  %s2275_s1 = inlined_call_operand.hbm [shape: f32[1,2,32], index: 1, kind: input, shape index: {}, may-alias: {1,5}]   ;;  %s2276_s2 = inlined_call_operand.vmem [shape: f32[32,32], index: 2, kind: input, shape index: {}]   ;;  %s2277_s3 = inlined_call_operand.vmem [shape: f32[33,16], index: 3, kind: input, shape index: {}]   ;;  %s2278_s4 = inlined_call_operand.hbm [shape: f32[2,16], index: 4, kind: output, shape index: {0}]   ;;  %s2279_s5 = inlined_call_operand.hbm [shape: f32[1,2,32], index: 5, kind: output, shape index: {1}, may-alias: {1,5}]  }
   0x1   :  { %12 = vsyncpa [#allocation4], 0 }
   0x2   :  { %13 = vsyncpa [#allocation7], 0  ;;  %s21_s20 = sshll.u32 %s2275_s1, 4  ;;  %s1929_s21 = smov [#allocation2]   ;;  %s22_s20 = int_to_ptr.hbm [resolvable:$true] %s21_s20 }
   0x3   :  { %s23_s22 = sshll.u32 %s1929_s21, 4  ;;  %s24_s22 = int_to_ptr.vmem [resolvable:$true] %s23_s22 }
   0x4   :  { %26 = dma.hbm_to_vmem [thread:$0]  %s22_s20, 32, %s24_s22, [#allocation3]  }
   0x5   :  { %1923 = dma.done.wait [#allocation3], 32  }
   0x6   :  { %1924 = vsyncadd [#allocation3], 4294967264  ;;  %vm41_vm0 = vcmask 261120   ;;  %v38_v0 = vld [vmem:[%s2276_s2 + $0x18] sm:$0xff]  ;;  %v37_v1 = vld [vmem:[%s2276_s2 + $0x10] sm:$0xff]  ;;  %vm1785_vm1 = vcmask 254976  }
   0x7   :  { %v36_v2 = vld [vmem:[%s2276_s2 + $0x8] sm:$0xff]  ;;  %v1974_v3 = vand.u32 4294901760, %v38_v0  ;;  %v1976_v4 = vand.u32 4294901760, %v37_v1  ;;  %v35_v6 = vld [vmem:[%s2276_s2] sm:$0xff]  ;;  %vm1770_vm2 = vcmask 123904   ;;  %s1805_s30 = sshll.u32 %s2279_s5, 4  ;;  %s1806_s30 = int_to_ptr.hbm [resolvable:$true] %s1805_s30 }
   0x8   :  { %v1978_v5 = vand.u32 4294901760, %v36_v2  ;;  %v39_v7 = vld [vmem:[#allocation2] sm:$0x3]  ;;  %v1983_v8 = vand.u32 4294901760, %v35_v6  ;;  %v1820_v61 = vld [vmem:[%s2274_s0 + $0x2] sm:$0x3] }
   0x9   :  { %v43_v9 = vsel %vm41_vm0, %v39_v7, 0  ;;  %v1987_v10 = vsub.f32 %v38_v0, %v1974_v3  ;;  %58 = vmatpush.msra.mxu0 %v1974_v3  ;;  %v1991_v11 = vsub.f32 %v37_v1, %v1976_v4  ;;  %158 = vmatpush.msra.mxu3 %v1974_v3  ;;  %v40_v40 = vld [vmem:[%s2274_s0] sm:$0x3]  ;;  %s1931_s6 = smov [#allocation5]   ;;  %s1794_s10 = sshll.u32 %s2278_s4, 4  ;;  %s1795_s10 = int_to_ptr.hbm [resolvable:$true] %s1794_s10 }
   0xa   :  { %v1995_v12 = vsub.f32 %v36_v2, %v1978_v5  ;;  %v65_v13 = vand.u32 4294901760, %v43_v9  ;;  %v1998_v14 = vsub.f32 %v35_v6, %v1983_v8  ;;  %s1792_s7 = sshll.u32 %s1931_s6, 4  ;;  %s1793_s7 = int_to_ptr.vmem [resolvable:$true] %s1792_s7 }
   0xb   :  { %129 = vmatpush.msra.mxu2 %v1987_v10  ;;  %60 = vmatpush.msra.mxu0 %v1976_v4  ;;  %v2003_v15 = vand.u32 4294901760, %v1987_v10  ;;  %v2006_v16 = vand.u32 4294901760, %v1991_v11 }
   0xc   :  { %v66_v17 = vsub.f32 %v43_v9, %v65_v13  ;;  %v2009_v18 = vand.u32 4294901760, %v1995_v12  ;;  %160 = vmatpush.msra.mxu3 %v1976_v4  ;;  %v2013_v19 = vand.u32 4294901760, %v1998_v14 }
   0xd   :  { %132 = vmatpush.msra.mxu2 %v1991_v11  ;;  %v89_v20 = vsub.f32 %v1987_v10, %v2003_v15  ;;  %62 = vmatpush.msra.mxu0 %v1978_v5  ;;  %v95_v21 = vsub.f32 %v1991_v11, %v2006_v16 }
   0xe   :  { %v101_v22 = vsub.f32 %v1995_v12, %v2009_v18  ;;  %v67_v23 = vand.u32 4294901760, %v66_v17  ;;  %162 = vmatpush.msra.mxu3 %v1978_v5  ;;  %v107_v27 = vsub.f32 %v1998_v14, %v2013_v19 }
   0xf   :  { %v2024_v24 = vand.u32 4294901760, %v89_v20  ;;  %135 = vmatpush.msra.mxu2 %v1995_v12  ;;  %v2027_v25 = vand.u32 4294901760, %v95_v21  ;;  %64 = vmatpush.msra.mxu0 %v1983_v8 }
  0x10   :  { %v68_v26 = vsub.f32 %v66_v17, %v67_v23  ;;  %164 = vmatpush.msra.mxu3 %v1983_v8  ;;  %v2036_v28 = vand.u32 4294901760, %v101_v22  ;;  %v2039_v30 = vand.u32 4294901760, %v107_v27 }
  0x11   :  { %187 = vmatpush.msrb.mxu0 %v2003_v15  ;;  %91 = vmatpush.msra.mxu1 %v2024_v24 }
  0x12   :  { %138 = vmatpush.msra.mxu2 %v1998_v14  ;;  %v69_v29 = vand.u32 4294901760, %v68_v26  ;;  %168 = vmatmul.f32.vlgmr.msra.gmra.mxu3 %v67_v23 }
  0x13   :  { %141 = vmatmul.f32.vlgmr.msra.gmra.mxu2 %v66_v17  ;;  %97 = vmatpush.msra.mxu1 %v2027_v25 }
  0x14   :  { %70 = vmatmul.f32.vlgmr.msra.gmra.mxu0 %v69_v29  ;;  %283 = vmatpush.msrb.mxu3 %v2024_v24 }
  0x15   :  { %191 = vmatpush.msrb.mxu0 %v2006_v16  ;;  %103 = vmatpush.msra.mxu1 %v2036_v28 }
  0x16   :  { %250 = vmatpush.msrb.mxu2 %v1974_v3  ;;  %289 = vmatpush.msrb.mxu3 %v2027_v25 }
  0x17   :  { %195 = vmatpush.msrb.mxu0 %v2009_v18  ;;  %109 = vmatpush.msra.mxu1 %v2039_v30 }
  0x18   :  { %252 = vmatpush.msrb.mxu2 %v1976_v4  ;;  %111 = vmatmul.f32.vlgmr.msra.gmra.mxu1 %v65_v13 }
  0x19   :  { %199 = vmatpush.msrb.mxu0 %v2013_v19  ;;  %218 = vmatpush.msrb.mxu1 %v1974_v3 }
  0x1a   :  { %295 = vmatpush.msrb.mxu3 %v2036_v28  ;;  %254 = vmatpush.msrb.mxu2 %v1978_v5 }
  0x1b   :  { %321 = vmatpush.msra.mxu0 %v1987_v10  ;;  %220 = vmatpush.msrb.mxu1 %v1976_v4 }
  0x1c   :  { %201 = vmatmul.f32.vlgmr.msrb.gmra.mxu0 %v65_v13  ;;  %301 = vmatpush.msrb.mxu3 %v2039_v30 }
  0x1d   :  { %324 = vmatpush.msra.mxu0 %v1991_v11  ;;  %222 = vmatpush.msrb.mxu1 %v1978_v5 }
  0x1e   :  { %410 = vmatpush.msra.mxu3 %v1974_v3  ;;  %256 = vmatpush.msrb.mxu2 %v1983_v8 }
  0x1f   :  { %327 = vmatpush.msra.mxu0 %v1995_v12  ;;  %224 = vmatpush.msrb.mxu1 %v1983_v8 }
  0x20   :  { %412 = vmatpush.msra.mxu3 %v1976_v4  ;;  %226 = vmatmul.f32.vlgmr.msrb.gmra.mxu1 %v65_v13 }
  0x21   :  { %330 = vmatpush.msra.mxu0 %v1998_v14  ;;  %350 = vmatpush.msra.mxu1 %v1974_v3 }
  0x22   :  { %414 = vmatpush.msra.mxu3 %v1978_v5  ;;  %379 = vmatpush.msra.mxu2 %v2003_v15 }
  0x23   :  { %442 = vmatpush.msrb.mxu0 %v1974_v3  ;;  %352 = vmatpush.msra.mxu1 %v1976_v4 }
  0x24   :  { %416 = vmatpush.msra.mxu3 %v1983_v8  ;;  %383 = vmatpush.msra.mxu2 %v2006_v16 }
  0x25   :  { %444 = vmatpush.msrb.mxu0 %v1976_v4  ;;  %354 = vmatpush.msra.mxu1 %v1978_v5 }
  0x26   :  { %387 = vmatpush.msra.mxu2 %v2009_v18 }
  0x27   :  { %446 = vmatpush.msrb.mxu0 %v1978_v5  ;;  %356 = vmatpush.msra.mxu1 %v1983_v8 }
  0x28   :  { %391 = vmatpush.msra.mxu2 %v2013_v19 }
  0x29   :  { %475 = vmatpush.msrb.mxu1 %v2024_v24  ;;  %448 = vmatpush.msrb.mxu0 %v1983_v8 }
  0x2b   :  { %481 = vmatpush.msrb.mxu1 %v2027_v25 }
  0x2d   :  { %487 = vmatpush.msrb.mxu1 %v2036_v28 }
  0x2f   :  { %493 = vmatpush.msrb.mxu1 %v2039_v30 }
  0x91   :  { %v71_v31 = vpop.f32.mrf.mxu0 }
  0x95   :  { %v112_v32 = vpop.f32.mrf.mxu1  ;;  %v169_v35 = vpop.f32.mrf.mxu3 }
  0x96   :  { %v142_v33 = vpop.f32.mrf.mxu2  ;;  %v113_v34 = vadd.f32 %v112_v32, %v71_v31 }
  0x98   :  { %v143_v36 = vadd.f32 %v142_v33, %v113_v34  ;;  %v1821_v33 = vld [vmem:[%s2274_s0 + $0x4] sm:$0x3] }
  0x99   :  { %v202_v37 = vpop.f32.mrf.mxu0 }
  0x9a   :  { %v170_v38 = vadd.f32 %v169_v35, %v143_v36 }
  0x9c   :  { %v203_v39 = vadd.f32 %v202_v37, %v170_v38 }
  0x9d   :  { %v227_v41 = vpop.f32.mrf.mxu1 }
  0x9e   :  { %v228_v42 = vadd.f32 %v227_v41, %v203_v39 }
  0xa0   :  { %v230_v43 = vadd.f32 %v228_v42, %v40_v40 }
  0xa2   :  { %1831 = vtanh.f32 %v230_v43 }
  0xa8   :  { %v1832_v44 = vpop.eup %1831 }
  0xa9   :  { %v235_v45 = vsel %vm41_vm0, %v1832_v44, 0 }
  0xaa   :  { %v257_v46 = vand.u32 4294901760, %v235_v45 }
  0xac   :  { %303 = vmatmul.f32.vlgmr.msrb.gmra.mxu3 %v257_v46  ;;  %v258_v47 = vsub.f32 %v235_v45, %v257_v46 }
  0xad   :  { %542 = vmatpush.msrb.mxu3 %v1974_v3 }
  0xae   :  { %333 = vmatmul.f32.vlgmr.msra.gmra.mxu0 %v258_v47  ;;  %v259_v48 = vand.u32 4294901760, %v258_v47 }
  0xaf   :  { %544 = vmatpush.msrb.mxu3 %v1976_v4  ;;  %571 = vmatpush.msra.mxu0 %v2003_v15 }
  0xb0   :  { %360 = vmatmul.f32.vlgmr.msra.gmra.mxu1 %v259_v48  ;;  %v260_v49 = vsub.f32 %v258_v47, %v259_v48 }
  0xb1   :  { %546 = vmatpush.msrb.mxu3 %v1978_v5  ;;  %602 = vmatpush.msra.mxu1 %v1974_v3 }
  0xb2   :  { %v261_v50 = vand.u32 4294901760, %v260_v49  ;;  %575 = vmatpush.msra.mxu0 %v2006_v16 }
  0xb3   :  { %548 = vmatpush.msrb.mxu3 %v1983_v8  ;;  %604 = vmatpush.msra.mxu1 %v1976_v4 }
  0xb4   :  { %262 = vmatmul.f32.vlgmr.msrb.gmra.mxu2 %v261_v50  ;;  %418 = vmatmul.f32.vlgmr.msra.gmra.mxu3 %v257_v46 }
  0xb5   :  { %513 = vmatpush.msrb.mxu2 %v1987_v10  ;;  %606 = vmatpush.msra.mxu1 %v1978_v5 }
  0xb6   :  { %579 = vmatpush.msra.mxu0 %v2009_v18  ;;  %667 = vmatpush.msra.mxu3 %v2024_v24 }
  0xb7   :  { %516 = vmatpush.msrb.mxu2 %v1991_v11  ;;  %608 = vmatpush.msra.mxu1 %v1983_v8 }
  0xb8   :  { %583 = vmatpush.msra.mxu0 %v2013_v19  ;;  %673 = vmatpush.msra.mxu3 %v2027_v25 }
  0xb9   :  { %519 = vmatpush.msrb.mxu2 %v1995_v12 }
  0xba   :  { %679 = vmatpush.msra.mxu3 %v2036_v28 }
  0xbb   :  { %522 = vmatpush.msrb.mxu2 %v1998_v14 }
  0xbc   :  { %393 = vmatmul.f32.vlgmr.msra.gmra.mxu2 %v257_v46  ;;  %685 = vmatpush.msra.mxu3 %v2039_v30 }
  0xbd   :  { %634 = vmatpush.msra.mxu2 %v1974_v3 }
  0xbf   :  { %636 = vmatpush.msra.mxu2 %v1976_v4 }
  0xc1   :  { %638 = vmatpush.msra.mxu2 %v1978_v5 }
  0xc3   :  { %640 = vmatpush.msra.mxu2 %v1983_v8 }
 0x12b   :  { %v334_v54 = vpop.f32.mrf.mxu0 }
 0x12d   :  { %v361_v56 = vpop.f32.mrf.mxu1 }
 0x12f   :  { %v304_v51 = vpop.f32.mrf.mxu3 }
 0x137   :  { %v263_v52 = vpop.f32.mrf.mxu2  ;;  %v419_v60 = vpop.f32.mrf.mxu3 }
 0x138   :  { %v305_v53 = vadd.f32 %v304_v51, %v263_v52 }
 0x13a   :  { %v335_v55 = vadd.f32 %v334_v54, %v305_v53  ;;  %v1822_v53 = vld [vmem:[%s2274_s0 + $0x6] sm:$0x3] }
 0x13c   :  { %v362_v57 = vadd.f32 %v361_v56, %v335_v55 }
 0x13f   :  { %v394_v58 = vpop.f32.mrf.mxu2 }
 0x140   :  { %v395_v59 = vadd.f32 %v394_v58, %v362_v57 }
 0x142   :  { %v420_v62 = vadd.f32 %v419_v60, %v395_v59 }
 0x144   :  { %v422_v63 = vadd.f32 %v1820_v61, %v420_v62 }
 0x146   :  { %1833 = vtanh.f32 %v422_v63 }
 0x14c   :  { %v1834_v0 = vpop.eup %1833 }
 0x14d   :  { %v427_v1 = vsel %vm41_vm0, %v1834_v0, 0 }
 0x14e   :  { %v449_v2 = vand.u32 4294901760, %v427_v1 }
 0x150   :  { %495 = vmatmul.f32.vlgmr.msrb.gmra.mxu1 %v449_v2  ;;  %v450_v6 = vsub.f32 %v427_v1, %v449_v2 }
 0x151   :  { %734 = vmatpush.msrb.mxu1 %v1974_v3 }
 0x152   :  { %525 = vmatmul.f32.vlgmr.msrb.gmra.mxu2 %v450_v6  ;;  %v451_v7 = vand.u32 4294901760, %v450_v6 }
 0x153   :  { %736 = vmatpush.msrb.mxu1 %v1976_v4  ;;  %763 = vmatpush.msrb.mxu2 %v2003_v15 }
 0x154   :  { %552 = vmatmul.f32.vlgmr.msrb.gmra.mxu3 %v451_v7  ;;  %v452_v9 = vsub.f32 %v450_v6, %v451_v7 }
 0x155   :  { %738 = vmatpush.msrb.mxu1 %v1978_v5  ;;  %794 = vmatpush.msrb.mxu3 %v1974_v3 }
 0x156   :  { %v453_v13 = vand.u32 4294901760, %v452_v9  ;;  %767 = vmatpush.msrb.mxu2 %v2006_v16 }
 0x157   :  { %740 = vmatpush.msrb.mxu1 %v1983_v8  ;;  %796 = vmatpush.msrb.mxu3 %v1976_v4 }
 0x158   :  { %454 = vmatmul.f32.vlgmr.msrb.gmra.mxu0 %v453_v13  ;;  %610 = vmatmul.f32.vlgmr.msra.gmra.mxu1 %v449_v2 }
 0x159   :  { %705 = vmatpush.msrb.mxu0 %v1987_v10  ;;  %798 = vmatpush.msrb.mxu3 %v1978_v5 }
 0x15a   :  { %771 = vmatpush.msrb.mxu2 %v2009_v18  ;;  %859 = vmatpush.msra.mxu1 %v2024_v24 }
 0x15b   :  { %708 = vmatpush.msrb.mxu0 %v1991_v11  ;;  %800 = vmatpush.msrb.mxu3 %v1983_v8 }
 0x15c   :  { %775 = vmatpush.msrb.mxu2 %v2013_v19  ;;  %865 = vmatpush.msra.mxu1 %v2027_v25 }
 0x15d   :  { %711 = vmatpush.msrb.mxu0 %v1995_v12 }
 0x15e   :  { %871 = vmatpush.msra.mxu1 %v2036_v28 }
 0x15f   :  { %714 = vmatpush.msrb.mxu0 %v1998_v14 }
 0x160   :  { %585 = vmatmul.f32.vlgmr.msra.gmra.mxu0 %v449_v2  ;;  %877 = vmatpush.msra.mxu1 %v2039_v30 }
 0x161   :  { %826 = vmatpush.msra.mxu0 %v1974_v3 }
 0x163   :  { %828 = vmatpush.msra.mxu0 %v1976_v4 }
 0x165   :  { %830 = vmatpush.msra.mxu0 %v1978_v5 }
 0x167   :  { %832 = vmatpush.msra.mxu0 %v1983_v8 }
 0x1cd   :  { %v496_v17 = vpop.f32.mrf.mxu1 }
 0x1d5   :  { %v455_v20 = vpop.f32.mrf.mxu0  ;;  %v526_v22 = vpop.f32.mrf.mxu2 }
 0x1d6   :  { %v497_v21 = vadd.f32 %v496_v17, %v455_v20  ;;  %v611_v32 = vpop.f32.mrf.mxu1 }
 0x1d7   :  { %v553_v26 = vpop.f32.mrf.mxu3 }
 0x1d8   :  { %v527_v23 = vadd.f32 %v526_v22, %v497_v21  ;;  %v1823_v21 = vld [vmem:[%s2274_s0 + $0x8] sm:$0x3] }
 0x1da   :  { %v554_v27 = vadd.f32 %v553_v26, %v527_v23 }
 0x1dd   :  { %v586_v29 = vpop.f32.mrf.mxu0 }
 0x1de   :  { %v587_v31 = vadd.f32 %v586_v29, %v554_v27 }
 0x1e0   :  { %v612_v34 = vadd.f32 %v611_v32, %v587_v31 }
 0x1e2   :  { %v614_v35 = vadd.f32 %v1821_v33, %v612_v34 }
 0x1e4   :  { %1835 = vtanh.f32 %v614_v35 }
 0x1ea   :  { %v1836_v36 = vpop.eup %1835 }
 0x1eb   :  { %v619_v37 = vsel %vm41_vm0, %v1836_v36, 0 }
 0x1ec   :  { %v641_v38 = vand.u32 4294901760, %v619_v37 }
 0x1ee   :  { %687 = vmatmul.f32.vlgmr.msra.gmra.mxu3 %v641_v38  ;;  %v642_v39 = vsub.f32 %v619_v37, %v641_v38 }
 0x1ef   :  { %926 = vmatpush.msra.mxu3 %v1974_v3 }
 0x1f0   :  { %717 = vmatmul.f32.vlgmr.msrb.gmra.mxu0 %v642_v39  ;;  %v643_v40 = vand.u32 4294901760, %v642_v39 }
 0x1f1   :  { %928 = vmatpush.msra.mxu3 %v1976_v4  ;;  %955 = vmatpush.msrb.mxu0 %v2003_v15 }
 0x1f2   :  { %744 = vmatmul.f32.vlgmr.msrb.gmra.mxu1 %v643_v40  ;;  %v644_v41 = vsub.f32 %v642_v39, %v643_v40 }
 0x1f3   :  { %930 = vmatpush.msra.mxu3 %v1978_v5  ;;  %986 = vmatpush.msrb.mxu1 %v1974_v3 }
 0x1f4   :  { %v645_v42 = vand.u32 4294901760, %v644_v41  ;;  %959 = vmatpush.msrb.mxu0 %v2006_v16 }
 0x1f5   :  { %932 = vmatpush.msra.mxu3 %v1983_v8  ;;  %988 = vmatpush.msrb.mxu1 %v1976_v4 }
 0x1f6   :  { %646 = vmatmul.f32.vlgmr.msra.gmra.mxu2 %v645_v42  ;;  %802 = vmatmul.f32.vlgmr.msrb.gmra.mxu3 %v641_v38 }
 0x1f7   :  { %897 = vmatpush.msra.mxu2 %v1987_v10  ;;  %990 = vmatpush.msrb.mxu1 %v1978_v5 }
 0x1f8   :  { %963 = vmatpush.msrb.mxu0 %v2009_v18  ;;  %1051 = vmatpush.msrb.mxu3 %v2024_v24 }
 0x1f9   :  { %900 = vmatpush.msra.mxu2 %v1991_v11  ;;  %992 = vmatpush.msrb.mxu1 %v1983_v8 }
 0x1fa   :  { %967 = vmatpush.msrb.mxu0 %v2013_v19  ;;  %1057 = vmatpush.msrb.mxu3 %v2027_v25 }
 0x1fb   :  { %903 = vmatpush.msra.mxu2 %v1995_v12 }
 0x1fc   :  { %1063 = vmatpush.msrb.mxu3 %v2036_v28 }
 0x1fd   :  { %906 = vmatpush.msra.mxu2 %v1998_v14 }
 0x1fe   :  { %777 = vmatmul.f32.vlgmr.msrb.gmra.mxu2 %v641_v38  ;;  %1069 = vmatpush.msrb.mxu3 %v2039_v30 }
 0x1ff   :  { %1018 = vmatpush.msrb.mxu2 %v1974_v3 }
 0x201   :  { %1020 = vmatpush.msrb.mxu2 %v1976_v4 }
 0x203   :  { %1022 = vmatpush.msrb.mxu2 %v1978_v5 }
 0x205   :  { %1024 = vmatpush.msrb.mxu2 %v1983_v8 }
 0x26d   :  { %v718_v46 = vpop.f32.mrf.mxu0 }
 0x26f   :  { %v745_v48 = vpop.f32.mrf.mxu1 }
 0x271   :  { %v688_v43 = vpop.f32.mrf.mxu3 }
 0x279   :  { %v647_v44 = vpop.f32.mrf.mxu2  ;;  %v803_v52 = vpop.f32.mrf.mxu3 }
 0x27a   :  { %v689_v45 = vadd.f32 %v688_v43, %v647_v44 }
 0x27c   :  { %v719_v47 = vadd.f32 %v718_v46, %v689_v45 }
 0x27e   :  { %v746_v49 = vadd.f32 %v745_v48, %v719_v47 }
 0x281   :  { %v778_v50 = vpop.f32.mrf.mxu2 }
 0x282   :  { %v779_v51 = vadd.f32 %v778_v50, %v746_v49 }
 0x284   :  { %v804_v54 = vadd.f32 %v803_v52, %v779_v51 }
 0x286   :  { %v806_v55 = vadd.f32 %v1822_v53, %v804_v54 }
 0x288   :  { %1837 = vtanh.f32 %v806_v55 }
 0x28e   :  { %v1838_v56 = vpop.eup %1837 }
 0x28f   :  { %v811_v57 = vsel %vm41_vm0, %v1838_v56, 0 }
 0x290   :  { %v833_v58 = vand.u32 4294901760, %v811_v57 }
 0x292   :  { %879 = vmatmul.f32.vlgmr.msra.gmra.mxu1 %v833_v58  ;;  %v834_v59 = vsub.f32 %v811_v57, %v833_v58 }
 0x293   :  { %1118 = vmatpush.msra.mxu1 %v1974_v3 }
 0x294   :  { %909 = vmatmul.f32.vlgmr.msra.gmra.mxu2 %v834_v59  ;;  %v835_v60 = vand.u32 4294901760, %v834_v59 }
 0x295   :  { %1120 = vmatpush.msra.mxu1 %v1976_v4  ;;  %1147 = vmatpush.msra.mxu2 %v2003_v15 }
 0x296   :  { %936 = vmatmul.f32.vlgmr.msra.gmra.mxu3 %v835_v60  ;;  %v836_v61 = vsub.f32 %v834_v59, %v835_v60  ;;  %v1579_v59 = vld [vmem:[%s2277_s3 + $0x18] sm:$0xff] }
 0x297   :  { %1122 = vmatpush.msra.mxu1 %v1978_v5  ;;  %1178 = vmatpush.msra.mxu3 %v1974_v3  ;;  %v1597_v60 = vand.u32 4294901760, %v1579_v59 }
 0x298   :  { %v837_v62 = vand.u32 4294901760, %v836_v61  ;;  %1151 = vmatpush.msra.mxu2 %v2006_v16  ;;  %v1578_v61 = vld [vmem:[%s2277_s3 + $0x10] sm:$0xff] }
 0x299   :  { %1124 = vmatpush.msra.mxu1 %v1983_v8  ;;  %1180 = vmatpush.msra.mxu3 %v1976_v4 }
 0x29a   :  { %838 = vmatmul.f32.vlgmr.msra.gmra.mxu0 %v837_v62  ;;  %994 = vmatmul.f32.vlgmr.msrb.gmra.mxu1 %v833_v58  ;;  %v1627_v62 = vsub.f32 %v1579_v59, %v1597_v60 }
 0x29b   :  { %1089 = vmatpush.msra.mxu0 %v1987_v10  ;;  %1182 = vmatpush.msra.mxu3 %v1978_v5 }
 0x29c   :  { %1155 = vmatpush.msra.mxu2 %v2009_v18  ;;  %1243 = vmatpush.msrb.mxu1 %v2024_v24 }
 0x29d   :  { %1092 = vmatpush.msra.mxu0 %v1991_v11  ;;  %1184 = vmatpush.msra.mxu3 %v1983_v8 }
 0x29e   :  { %1159 = vmatpush.msra.mxu2 %v2013_v19  ;;  %1249 = vmatpush.msrb.mxu1 %v2027_v25 }
 0x29f   :  { %1095 = vmatpush.msra.mxu0 %v1995_v12 }
 0x2a0   :  { %1255 = vmatpush.msrb.mxu1 %v2036_v28 }
 0x2a1   :  { %1098 = vmatpush.msra.mxu0 %v1998_v14 }
 0x2a2   :  { %969 = vmatmul.f32.vlgmr.msrb.gmra.mxu0 %v833_v58  ;;  %1261 = vmatpush.msrb.mxu1 %v2039_v30 }
 0x2a3   :  { %1210 = vmatpush.msrb.mxu0 %v1974_v3 }
 0x2a5   :  { %1212 = vmatpush.msrb.mxu0 %v1976_v4 }
 0x2a7   :  { %1214 = vmatpush.msrb.mxu0 %v1978_v5 }
 0x2a9   :  { %1216 = vmatpush.msrb.mxu0 %v1983_v8 }
 0x30f   :  { %v880_v63 = vpop.f32.mrf.mxu1 }
 0x317   :  { %v839_v0 = vpop.f32.mrf.mxu0  ;;  %v910_v2 = vpop.f32.mrf.mxu2 }
 0x318   :  { %v881_v1 = vadd.f32 %v880_v63, %v839_v0  ;;  %v995_v20 = vpop.f32.mrf.mxu1  ;;  %v1599_v63 = vand.u32 4294901760, %v1578_v61  ;;  %v1577_v0 = vld [vmem:[%s2277_s3 + $0x8] sm:$0xff] }
 0x319   :  { %v937_v7 = vpop.f32.mrf.mxu3 }
 0x31a   :  { %v911_v6 = vadd.f32 %v910_v2, %v881_v1  ;;  %v1628_v1 = vand.u32 4294901760, %v1627_v62  ;;  %v1633_v2 = vsub.f32 %v1578_v61, %v1599_v63 }
 0x31c   :  { %v938_v9 = vadd.f32 %v937_v7, %v911_v6  ;;  %v1601_v6 = vand.u32 4294901760, %v1577_v0  ;;  %v1576_v7 = vld [vmem:[%s2277_s3] sm:$0xff] }
 0x31f   :  { %v970_v13 = vpop.f32.mrf.mxu0 }
 0x320   :  { %v971_v17 = vadd.f32 %v970_v13, %v938_v9  ;;  %v1629_v9 = vsub.f32 %v1627_v62, %v1628_v1  ;;  %v1634_v13 = vand.u32 4294901760, %v1633_v2 }
 0x322   :  { %v996_v22 = vadd.f32 %v995_v20, %v971_v17  ;;  %v1639_v17 = vsub.f32 %v1577_v0, %v1601_v6  ;;  %v1603_v20 = vand.u32 4294901760, %v1576_v7 }
 0x324   :  { %v998_v23 = vadd.f32 %v1823_v21, %v996_v22  ;;  %v1630_v21 = vand.u32 4294901760, %v1629_v9  ;;  %v1635_v22 = vsub.f32 %v1633_v2, %v1634_v13 }
 0x326   :  { %1839 = vtanh.f32 %v998_v23  ;;  %v1640_v23 = vand.u32 4294901760, %v1639_v17 }
 0x32c   :  { %v1840_v26 = vpop.eup %1839 }
 0x32d   :  { %v1003_v27 = vsel %vm41_vm0, %v1840_v26, 0  ;;  %v1645_v26 = vsub.f32 %v1576_v7, %v1603_v20 }
 0x32e   :  { %v1025_v29 = vand.u32 4294901760, %v1003_v27 }
 0x330   :  { %1071 = vmatmul.f32.vlgmr.msrb.gmra.mxu3 %v1025_v29  ;;  %v1026_v31 = vsub.f32 %v1003_v27, %v1025_v29  ;;  %v1636_v27 = vand.u32 4294901760, %v1635_v22 }
 0x331   :  { %1310 = vmatpush.msrb.mxu3 %v1974_v3 }
 0x332   :  { %1101 = vmatmul.f32.vlgmr.msra.gmra.mxu0 %v1026_v31  ;;  %v1027_v32 = vand.u32 4294901760, %v1026_v31 }
 0x333   :  { %1312 = vmatpush.msrb.mxu3 %v1976_v4  ;;  %1339 = vmatpush.msra.mxu0 %v2003_v15 }
 0x334   :  { %1128 = vmatmul.f32.vlgmr.msra.gmra.mxu1 %v1027_v32  ;;  %v1028_v33 = vsub.f32 %v1026_v31, %v1027_v32  ;;  %v1646_v31 = vand.u32 4294901760, %v1645_v26 }
 0x335   :  { %1314 = vmatpush.msrb.mxu3 %v1978_v5  ;;  %1370 = vmatpush.msra.mxu1 %v1974_v3 }
 0x336   :  { %v1029_v34 = vand.u32 4294901760, %v1028_v33  ;;  %1343 = vmatpush.msra.mxu0 %v2006_v16  ;;  %v1647_v33 = vsub.f32 %v1645_v26, %v1646_v31 }
 0x337   :  { %1316 = vmatpush.msrb.mxu3 %v1983_v8  ;;  %1372 = vmatpush.msra.mxu1 %v1976_v4 }
 0x338   :  { %1030 = vmatmul.f32.vlgmr.msrb.gmra.mxu2 %v1029_v34  ;;  %1186 = vmatmul.f32.vlgmr.msra.gmra.mxu3 %v1025_v29  ;;  %v1648_v34 = vand.u32 4294901760, %v1647_v33 }
 0x339   :  { %1281 = vmatpush.msrb.mxu2 %v1987_v10  ;;  %1374 = vmatpush.msra.mxu1 %v1978_v5 }
 0x33a   :  { %1347 = vmatpush.msra.mxu0 %v2009_v18  ;;  %1435 = vmatpush.msra.mxu3 %v2024_v24 }
 0x33b   :  { %1284 = vmatpush.msrb.mxu2 %v1991_v11  ;;  %1376 = vmatpush.msra.mxu1 %v1983_v8 }
 0x33c   :  { %1351 = vmatpush.msra.mxu0 %v2013_v19  ;;  %1441 = vmatpush.msra.mxu3 %v2027_v25 }
 0x33d   :  { %1287 = vmatpush.msrb.mxu2 %v1995_v12 }
 0x33e   :  { %1447 = vmatpush.msra.mxu3 %v2036_v28 }
 0x33f   :  { %1290 = vmatpush.msrb.mxu2 %v1998_v14 }
 0x340   :  { %1161 = vmatmul.f32.vlgmr.msra.gmra.mxu2 %v1025_v29  ;;  %1453 = vmatpush.msra.mxu3 %v2039_v30  ;;  %v1824_v30 = vld [vmem:[%s2274_s0 + $0xa] sm:$0x3]  ;;  %v1641_v29 = vsub.f32 %v1639_v17, %v1640_v23 }
 0x341   :  { %1402 = vmatpush.msra.mxu2 %v1974_v3 }
 0x342   :  { %v1642_v32 = vand.u32 4294901760, %v1641_v29 }
 0x343   :  { %1404 = vmatpush.msra.mxu2 %v1976_v4 }
 0x345   :  { %1406 = vmatpush.msra.mxu2 %v1978_v5 }
 0x347   :  { %1408 = vmatpush.msra.mxu2 %v1983_v8 }
 0x3af   :  { %v1102_v36 = vpop.f32.mrf.mxu0 }
 0x3b1   :  { %v1129_v38 = vpop.f32.mrf.mxu1 }
 0x3b3   :  { %v1072_v24 = vpop.f32.mrf.mxu3 }
 0x3bb   :  { %v1031_v35 = vpop.f32.mrf.mxu2  ;;  %v1187_v41 = vpop.f32.mrf.mxu3 }
 0x3bc   :  { %v1073_v25 = vadd.f32 %v1072_v24, %v1031_v35 }
 0x3be   :  { %v1103_v37 = vadd.f32 %v1102_v36, %v1073_v25 }
 0x3c0   :  { %v1130_v28 = vadd.f32 %v1129_v38, %v1103_v37 }
 0x3c3   :  { %v1162_v39 = vpop.f32.mrf.mxu2 }
 0x3c4   :  { %v1163_v40 = vadd.f32 %v1162_v39, %v1130_v28 }
 0x3c6   :  { %v1188_v42 = vadd.f32 %v1187_v41, %v1163_v40 }
 0x3c8   :  { %v1190_v43 = vadd.f32 %v1824_v30, %v1188_v42  ;;  %v1826_v30 = vld [vmem:[%s2274_s0 + $0xe] sm:$0x3] }
 0x3ca   :  { %1841 = vtanh.f32 %v1190_v43 }
 0x3d0   :  { %v1842_v44 = vpop.eup %1841 }
 0x3d1   :  { %v1195_v45 = vsel %vm41_vm0, %v1842_v44, 0 }
 0x3d2   :  { %v1217_v46 = vand.u32 4294901760, %v1195_v45 }
 0x3d4   :  { %1263 = vmatmul.f32.vlgmr.msrb.gmra.mxu1 %v1217_v46  ;;  %v1218_v47 = vsub.f32 %v1195_v45, %v1217_v46 }
 0x3d5   :  { %1502 = vmatpush.msrb.mxu1 %v1974_v3 }
 0x3d6   :  { %1293 = vmatmul.f32.vlgmr.msrb.gmra.mxu2 %v1218_v47  ;;  %v1219_v48 = vand.u32 4294901760, %v1218_v47 }
 0x3d7   :  { %1504 = vmatpush.msrb.mxu1 %v1976_v4  ;;  %1531 = vmatpush.msrb.mxu2 %v2003_v15 }
 0x3d8   :  { %1320 = vmatmul.f32.vlgmr.msrb.gmra.mxu3 %v1219_v48  ;;  %v1220_v49 = vsub.f32 %v1218_v47, %v1219_v48 }
 0x3d9   :  { %1506 = vmatpush.msrb.mxu1 %v1978_v5  ;;  %1562 = vmatpush.msrb.mxu3 %v1974_v3 }
 0x3da   :  { %v1221_v50 = vand.u32 4294901760, %v1220_v49  ;;  %1535 = vmatpush.msrb.mxu2 %v2006_v16 }
 0x3db   :  { %1508 = vmatpush.msrb.mxu1 %v1983_v8  ;;  %1564 = vmatpush.msrb.mxu3 %v1976_v4 }
 0x3dc   :  { %1222 = vmatmul.f32.vlgmr.msrb.gmra.mxu0 %v1221_v50  ;;  %1378 = vmatmul.f32.vlgmr.msra.gmra.mxu1 %v1217_v46 }
 0x3dd   :  { %1473 = vmatpush.msrb.mxu0 %v1987_v10  ;;  %1566 = vmatpush.msrb.mxu3 %v1978_v5 }
 0x3de   :  { %1539 = vmatpush.msrb.mxu2 %v2009_v18  ;;  %1631 = vmatpush.msra.mxu1 %v1630_v21 }
 0x3df   :  { %1476 = vmatpush.msrb.mxu0 %v1991_v11  ;;  %1568 = vmatpush.msrb.mxu3 %v1983_v8  ;;  %v1825_v8 = vld [vmem:[%s2274_s0 + $0xc] sm:$0x3] }
 0x3e0   :  { %1543 = vmatpush.msrb.mxu2 %v2013_v19  ;;  %1637 = vmatpush.msra.mxu1 %v1636_v27 }
 0x3e1   :  { %1479 = vmatpush.msrb.mxu0 %v1995_v12 }
 0x3e2   :  { %1643 = vmatpush.msra.mxu1 %v1642_v32 }
 0x3e3   :  { %1482 = vmatpush.msrb.mxu0 %v1998_v14 }
 0x3e4   :  { %1353 = vmatmul.f32.vlgmr.msra.gmra.mxu0 %v1217_v46  ;;  %1649 = vmatpush.msra.mxu1 %v1648_v34 }
 0x3e5   :  { %1598 = vmatpush.msra.mxu0 %v1597_v60 }
 0x3e7   :  { %1600 = vmatpush.msra.mxu0 %v1599_v63 }
 0x3e9   :  { %1602 = vmatpush.msra.mxu0 %v1601_v6 }
 0x3eb   :  { %1604 = vmatpush.msra.mxu0 %v1603_v20 }
 0x451   :  { %v1264_v3 = vpop.f32.mrf.mxu1 }
 0x459   :  { %v1223_v4 = vpop.f32.mrf.mxu0  ;;  %v1294_v16 = vpop.f32.mrf.mxu2 }
 0x45a   :  { %v1265_v15 = vadd.f32 %v1264_v3, %v1223_v4  ;;  %v1379_v53 = vpop.f32.mrf.mxu1  ;;  %v1830_v3 = vld [vmem:[%s2277_s3 + $0x20] ss:$0 sm:$0xff]  ;;  %s1930_s3 = smov [#allocation6]  }
 0x45b   :  { %v1321_v51 = vpop.f32.mrf.mxu3  ;;  %s1803_s1 = sshll.u32 %s1930_s3, 4  ;;  %s1804_s1 = int_to_ptr.vmem [resolvable:$true] %s1803_s1 }
 0x45c   :  { %v1295_v10 = vadd.f32 %v1294_v16, %v1265_v15 }
 0x45e   :  { %v1322_v5 = vadd.f32 %v1321_v51, %v1295_v10 }
 0x461   :  { %v1354_v52 = vpop.f32.mrf.mxu0 }
 0x462   :  { %v1355_v18 = vadd.f32 %v1354_v52, %v1322_v5 }
 0x464   :  { %v1380_v11 = vadd.f32 %v1379_v53, %v1355_v18 }
 0x466   :  { %v1382_v19 = vadd.f32 %v1825_v8, %v1380_v11 }
 0x468   :  { %1843 = vtanh.f32 %v1382_v19 }
 0x46e   :  { %v1844_v12 = vpop.eup %1843 }
 0x46f   :  { %v1387_v14 = vsel %vm41_vm0, %v1844_v12, 0 }
 0x470   :  { %v1409_v54 = vand.u32 4294901760, %v1387_v14 }
 0x472   :  { %1455 = vmatmul.f32.vlgmr.msra.gmra.mxu3 %v1409_v54  ;;  %v1410_v55 = vsub.f32 %v1387_v14, %v1409_v54 }
 0x473   :  { %1698 = vmatpush.msra.mxu3 %v1597_v60 }
 0x474   :  { %1485 = vmatmul.f32.vlgmr.msrb.gmra.mxu0 %v1410_v55  ;;  %v1411_v56 = vand.u32 4294901760, %v1410_v55 }
 0x475   :  { %1700 = vmatpush.msra.mxu3 %v1599_v63  ;;  %1727 = vmatpush.msrb.mxu0 %v1628_v1 }
 0x476   :  { %1512 = vmatmul.f32.vlgmr.msrb.gmra.mxu1 %v1411_v56  ;;  %v1412_v57 = vsub.f32 %v1410_v55, %v1411_v56 }
 0x477   :  { %1702 = vmatpush.msra.mxu3 %v1601_v6  ;;  %1731 = vmatpush.msrb.mxu0 %v1634_v13 }
 0x478   :  { %v1413_v58 = vand.u32 4294901760, %v1412_v57  ;;  %1758 = vmatpush.msrb.mxu1 %v1597_v60 }
 0x479   :  { %1704 = vmatpush.msra.mxu3 %v1603_v20  ;;  %1735 = vmatpush.msrb.mxu0 %v1640_v23 }
 0x47a   :  { %1414 = vmatmul.f32.vlgmr.msra.gmra.mxu2 %v1413_v58  ;;  %1570 = vmatmul.f32.vlgmr.msrb.gmra.mxu3 %v1409_v54 }
 0x47b   :  { %1669 = vmatpush.msra.mxu2 %v1627_v62  ;;  %1739 = vmatpush.msrb.mxu0 %v1646_v31 }
 0x47c   :  { %1760 = vmatpush.msrb.mxu1 %v1599_v63 }
 0x47d   :  { %1672 = vmatpush.msra.mxu2 %v1633_v2 }
 0x47e   :  { %1762 = vmatpush.msrb.mxu1 %v1601_v6 }
 0x47f   :  { %1675 = vmatpush.msra.mxu2 %v1639_v17 }
 0x480   :  { %1764 = vmatpush.msrb.mxu1 %v1603_v20 }
 0x481   :  { %1678 = vmatpush.msra.mxu2 %v1645_v26 }
 0x482   :  { %1545 = vmatmul.f32.vlgmr.msrb.gmra.mxu2 %v1409_v54 }
 0x4f1   :  { %v1486_v36 = vpop.f32.mrf.mxu0 }
 0x4f3   :  { %v1513_v38 = vpop.f32.mrf.mxu1 }
 0x4f5   :  { %v1456_v24 = vpop.f32.mrf.mxu3 }
 0x4fd   :  { %v1415_v35 = vpop.f32.mrf.mxu2  ;;  %v1571_v41 = vpop.f32.mrf.mxu3 }
 0x4fe   :  { %v1457_v25 = vadd.f32 %v1456_v24, %v1415_v35 }
 0x500   :  { %v1487_v37 = vadd.f32 %v1486_v36, %v1457_v25 }
 0x502   :  { %v1514_v28 = vadd.f32 %v1513_v38, %v1487_v37 }
 0x505   :  { %v1546_v39 = vpop.f32.mrf.mxu2 }
 0x506   :  { %v1547_v40 = vadd.f32 %v1546_v39, %v1514_v28 }
 0x508   :  { %v1572_v42 = vadd.f32 %v1571_v41, %v1547_v40 }
 0x50a   :  { %v1574_v43 = vadd.f32 %v1826_v30, %v1572_v42 }
 0x50c   :  { %1845 = vtanh.f32 %v1574_v43 }
 0x512   :  { %v1846_v44 = vpop.eup %1845 }
 0x513   :  { %v1583_v45 = vsel %vm41_vm0, %v1846_v44, 0  ;;  %1786 = vst.msk [vmem:[#allocation6] sm:$0x3] %vm1785_vm1, %v1846_v44 }
 0x514   :  { %v1605_v46 = vand.u32 4294901760, %v1583_v45  ;;  %1808 = dma.vmem_to_hbm [thread:$0]  %s1804_s1, 32, %s1806_s30, [#allocation7]  }
 0x516   :  { %1651 = vmatmul.f32.vlgmr.msra.gmra.mxu1 %v1605_v46  ;;  %v1606_v47 = vsub.f32 %v1583_v45, %v1605_v46 }
 0x518   :  { %1681 = vmatmul.f32.vlgmr.msra.gmra.mxu2 %v1606_v47  ;;  %v1607_v48 = vand.u32 4294901760, %v1606_v47 }
 0x51a   :  { %1708 = vmatmul.f32.vlgmr.msra.gmra.mxu3 %v1607_v48  ;;  %v1608_v49 = vsub.f32 %v1606_v47, %v1607_v48 }
 0x51c   :  { %v1609_v50 = vand.u32 4294901760, %v1608_v49 }
 0x51e   :  { %1610 = vmatmul.f32.vlgmr.msra.gmra.mxu0 %v1609_v50  ;;  %1766 = vmatmul.f32.vlgmr.msrb.gmra.mxu1 %v1605_v46 }
 0x526   :  { %1741 = vmatmul.f32.vlgmr.msrb.gmra.mxu0 %v1605_v46 }
 0x593   :  { %v1652_v4 = vpop.f32.mrf.mxu1 }
 0x59b   :  { %v1611_v15 = vpop.f32.mrf.mxu0  ;;  %v1682_v51 = vpop.f32.mrf.mxu2 }
 0x59c   :  { %v1612_v16 = vadd.f32 %v1830_v3, %v1611_v15  ;;  %v1767_v11 = vpop.f32.mrf.mxu1 }
 0x59d   :  { %v1709_v52 = vpop.f32.mrf.mxu3 }
 0x59e   :  { %v1653_v10 = vadd.f32 %v1652_v4, %v1612_v16 }
 0x5a0   :  { %v1683_v5 = vadd.f32 %v1682_v51, %v1653_v10 }
 0x5a2   :  { %v1710_v18 = vadd.f32 %v1709_v52, %v1683_v5 }
 0x5a3   :  { %v1742_v53 = vpop.f32.mrf.mxu0 }
 0x5a4   :  { %v1743_v8 = vadd.f32 %v1742_v53, %v1710_v18 }
 0x5a6   :  { %v1768_v19 = vadd.f32 %v1767_v11, %v1743_v8 }
 0x5a8   :  { %v1771_v12 = vsel %vm1770_vm2, %v1768_v19, -inf }
 0x5a9   :  { %1772 = vmax.xlane.f32.xlu0 %v1771_v12 }
 0x61c   :  { %v1773_v14 = vpop.xlane.xlu0 %1772 }
 0x61d   :  { %v1774_v54 = vsub.f32 %v1768_v19, %v1773_v14 }
 0x61f   :  { %v1775_v55 = vmul.f32 1.442695, %v1774_v54 }
 0x621   :  { %1847 = vpow2.f32 %v1775_v55 }
 0x627   :  { %v1848_v56 = vpop.eup %1847 }
 0x628   :  { %v1777_v57 = vsel %vm1770_vm2, %v1848_v56, 0.0 }
 0x629   :  { %1778 = vadd.xlane.f32.xlu0 %v1777_v57 }
 0x69c   :  { %v1779_v58 = vpop.xlane.xlu0 %1778 }
 0x69d   :  { %1849 = vlog2.f32 %v1779_v58 }
 0x6a3   :  { %v1850_v59 = vpop.eup %1849 }
 0x6a4   :  { %v1781_v60 = vmul.f32 0.6931472, %v1850_v59 }
 0x6a6   :  { %v1782_v61 = vadd.f32 %v1781_v60, %v1773_v14 }
 0x6a8   :  { %v1783_v62 = vsub.f32 %v1768_v19, %v1782_v61 }
 0x6aa   :  { %1784 = vst.msk [vmem:[#allocation5] sm:$0x3] %vm1770_vm2, %v1783_v62 }
 0x6ab   :  { %1797 = dma.vmem_to_hbm [thread:$0]  %s1793_s7, 32, %s1795_s10, [#allocation4]  }
 0x6ac   :  { %1925 = dma.done.wait [#allocation4], 32  }
 0x6ad   :  { %1926 = vsyncadd [#allocation4], 4294967264 }
 0x6ae   :  { %1927 = dma.done.wait [#allocation7], 32  }
 0x6af   :  { %1928 = vsyncadd [#allocation7], 4294967264 }
 0x6b0   :  { %1817 = vsyncpa [#allocation3], 1 }
 0x6b1   :  { %1818 = vsyncpa [#allocation4], 1 }
 0x6b2   :  { %1819 = vsyncpa [#allocation7], 1 }

</bundles_post_ra>
